<compile_context>
chip_gen: v6e
topology: v6e:2x2x1
jax: 0.10.0
libtpu: 0.0.40
codegen_flags: <defaults>
</compile_context>

<pallas_src>
import functools

import jax
import jax.numpy as jnp
from jax import lax
from jax.experimental import pallas as pl
from jax.experimental.pallas import tpu as pltpu

_VMEM_LIMIT = 32 * 1024 * 1024  # safe on v5e/v6e (128 MiB) and v7x (64 MiB)


def _pick_tile(n, candidates):
    """Largest candidate that evenly divides n, else the full extent."""
    for c in candidates:
        if n % c == 0:
            return c
    return n


# ----------------------------------------------------------------------------
# Kernel 1: fused 1x1 conv + (eval-mode, folded) BatchNorm + ReLU
# ----------------------------------------------------------------------------
def _conv1x1_bn_relu_kernel(x_ref, w_ref, b_ref, o_ref):
    # x_ref: (tm, Cin) bf16   w_ref: (Cin, tco) bf16   b_ref: (1, tco) f32
    acc = jnp.dot(x_ref[...], w_ref[...], preferred_element_type=jnp.float32)
    o_ref[...] = jnp.maximum(acc + b_ref[...], 0.0).astype(o_ref.dtype)


def conv1x1_bn_relu(x_nhwc, weight, bias, gamma, beta, mean, var,
                    stride=1, eps=1e-5):
    """CGUnit-style block: Conv2d(k=1) -> BatchNorm2d(eval) -> ReLU (NHWC)."""
    x = x_nhwc[:, ::stride, ::stride, :]
    B, H, W, Cin = x.shape
    Cout = weight.shape[0]
    M = B * H * W

    # fold BN into the conv (plain JAX parameter glue, runs once under jit)
    scale = gamma / jnp.sqrt(var + eps)                                  # (Cout,)
    w_fold = (weight.reshape(Cout, Cin) * scale[:, None]).T.astype(jnp.bfloat16)
    b_fold = ((bias - mean) * scale + beta).reshape(1, Cout).astype(jnp.float32)

    xm = x.reshape(M, Cin).astype(jnp.bfloat16)

    tm = _pick_tile(M, (512, 256, 128, 64, 32, 16, 8))     # rows per block
    tco = _pick_tile(Cout, (256, 128))                      # output channels

    cost = pl.CostEstimate(
        flops=2 * M * Cin * Cout,
        transcendentals=0,
        bytes_accessed=2 * (M * Cin + Cin * Cout + M * Cout) + 4 * Cout)

    out = pl.pallas_call(
        _conv1x1_bn_relu_kernel,
        out_shape=jax.ShapeDtypeStruct((M, Cout), jnp.bfloat16),
        grid=(M // tm, Cout // tco),
        in_specs=[
            pl.BlockSpec((tm, Cin), lambda i, j: (i, 0)),
            pl.BlockSpec((Cin, tco), lambda i, j: (0, j)),
            pl.BlockSpec((1, tco), lambda i, j: (0, j)),
        ],
        out_specs=pl.BlockSpec((tm, tco), lambda i, j: (i, j)),
        compiler_params=pltpu.CompilerParams(
            dimension_semantics=("parallel", "parallel"),
            vmem_limit_bytes=_VMEM_LIMIT),
        cost_estimate=cost,
    )(xm, w_fold, b_fold)
    return out.reshape(B, H, W, Cout)


# ----------------------------------------------------------------------------
# Kernel 2: fused CGUnit (conv+BN+ReLU) + classifier 1x1 conv [+ ReLU]
#   The CG intermediate (M, Cout) never leaves VMEM; the channel axis is a
#   reduction grid axis and the tiny (nc, tm) accumulator lives in scratch.
# ----------------------------------------------------------------------------
def _cg_cls_kernel(x_ref, wcg_ref, bcg_ref, wcls_ref, o_ref, acc_ref, *,
                   relu_out):
    j = pl.program_id(1)

    @pl.when(j == 0)
    def _():
        acc_ref[...] = jnp.zeros_like(acc_ref)

    # CGUnit on this channel slab: (tm, Cin) @ (Cin, tco) -> (tm, tco)
    h = jnp.dot(x_ref[...], wcg_ref[...], preferred_element_type=jnp.float32)
    h = jnp.maximum(h + bcg_ref[...], 0.0).astype(jnp.bfloat16)

    # classifier partial: (nc, tco) . (tm, tco)^T -> (nc, tm)  (lane-dense)
    acc_ref[...] += lax.dot_general(
        wcls_ref[...], h,
        dimension_numbers=(((1,), (1,)), ((), ())),
        preferred_element_type=jnp.float32)

    @pl.when(j == pl.num_programs(1) - 1)
    def _():
        res = acc_ref[...]
        if relu_out:
            res = jnp.maximum(res, 0.0)
        o_ref[...] = res


def cg_classifier(feat_nhwc, cg_params, cls_weight, *, relu_out, eps=1e-5):
    """relu?(conv_cls(relu(bn(conv_cg(x)))))  ->  (n_classes, B*H*W)."""
    B, H, W, Cin = feat_nhwc.shape
    Cout = cg_params["weight"].shape[0]
    nc = cls_weight.shape[0]
    M = B * H * W

    scale = cg_params["gamma"] / jnp.sqrt(cg_params["var"] + eps)
    w_cg = (cg_params["weight"].reshape(Cout, Cin) * scale[:, None]
            ).T.astype(jnp.bfloat16)                                   # (Cin, Cout)
    b_cg = ((cg_params["bias"] - cg_params["mean"]) * scale + cg_params["beta"]
            ).reshape(1, Cout).astype(jnp.float32)
    w_cls = cls_weight.reshape(nc, Cout).astype(jnp.bfloat16)

    xm = feat_nhwc.reshape(M, Cin).astype(jnp.bfloat16)

    tm = _pick_tile(M, (1024, 512, 256, 128, 64, 32, 16, 8))
    tco = _pick_tile(Cout, (512, 256, 128))

    cost = pl.CostEstimate(
        flops=2 * M * Cin * Cout + 2 * M * Cout * nc,
        transcendentals=0,
        bytes_accessed=2 * (M * Cin + Cin * Cout + nc * Cout)
                       + 4 * (Cout + nc * M))

    kern = functools.partial(_cg_cls_kernel, relu_out=relu_out)

    out = pl.pallas_call(
        kern,
        out_shape=jax.ShapeDtypeStruct((nc, M), jnp.float32),
        grid=(M // tm, Cout // tco),
        in_specs=[
            pl.BlockSpec((tm, Cin), lambda i, j: (i, 0)),
            pl.BlockSpec((Cin, tco), lambda i, j: (0, j)),
            pl.BlockSpec((1, tco), lambda i, j: (0, j)),
            pl.BlockSpec((nc, tco), lambda i, j: (0, j)),
        ],
        out_specs=pl.BlockSpec((nc, tm), lambda i, j: (0, i)),
        scratch_shapes=[pltpu.VMEM((nc, tm), jnp.float32)],
        compiler_params=pltpu.CompilerParams(
            dimension_semantics=("parallel", "arbitrary"),
            vmem_limit_bytes=_VMEM_LIMIT),
        cost_estimate=cost,
    )(xm, w_cg, b_cg, w_cls)
    return out  # (nc, M)


def cam_head(feat_nhwc, cg_params, cls_weight):
    """relu(cls(cg(x)))[0] + relu(cls(cg(x)))[1].flip(W)  ->  (nc, H, W)."""
    B, H, W, _ = feat_nhwc.shape
    assert B == 2, "CAM fusion expects batch = (img, hflip img)"
    nc = cls_weight.shape[0]
    out = cg_classifier(feat_nhwc, cg_params, cls_weight, relu_out=True)
    cams = out.reshape(nc, B, H, W)                       # tiny
    return cams[:, 0] + jnp.flip(cams[:, 1], axis=-1)     # flip on tiny map


def separate_head(feat_nhwc, cg_params, cls_weight):
    """Raw classifier map (no ReLU)  ->  (B, nc, H, W)."""
    B, H, W, _ = feat_nhwc.shape
    nc = cls_weight.shape[0]
    out = cg_classifier(feat_nhwc, cg_params, cls_weight, relu_out=False)
    return jnp.transpose(out.reshape(nc, B, H, W), (1, 0, 2, 3))


# ----------------------------------------------------------------------------
# Parameters & module
# ----------------------------------------------------------------------------
def _init_conv_bn(key, cin, cout):
    kw, kb, kg, kbe, km, kv = jax.random.split(key, 6)
    return dict(
        weight=jax.random.normal(kw, (cout, cin, 1, 1), jnp.float32) / jnp.sqrt(cin),
        bias=0.1 * jax.random.normal(kb, (cout,), jnp.float32),
        gamma=1.0 + 0.1 * jax.random.normal(kg, (cout,), jnp.float32),
        beta=0.1 * jax.random.normal(kbe, (cout,), jnp.float32),
        mean=0.1 * jax.random.normal(km, (cout,), jnp.float32),
        var=jnp.abs(jax.random.normal(kv, (cout,), jnp.float32)) + 0.5,
    )


class CAMPallas:
    """Pallas port of CAM (stride=32 config: strides 4,2,1,1; channels 256/512/1024/2048)."""

    def __init__(self, key, n_classes=2):
        keys = jax.random.split(key, 12)
        # TODO(synk): the pretrained ResNet50 backbone (7x7 conv, maxpool,
        # bottleneck residual blocks, dilation) has no compact Pallas
        # translation here; each stage is stood in by a strided 1x1
        # conv+BN+ReLU with the same channel / stride signature.
        self.stage1 = _init_conv_bn(keys[0], 3, 256)      # stride 4 overall
        self.stage2 = _init_conv_bn(keys[1], 256, 512)    # stride 2
        self.stage3 = _init_conv_bn(keys[2], 512, 1024)   # stride 1 (dilated)
        self.stage4 = _init_conv_bn(keys[3], 1024, 2048)  # stride 1 (dilated)
        # CGUnits (exact: Conv2d(k=1) + BN + ReLU)
        self.cg1 = _init_conv_bn(keys[4], 256, 256)
        self.cg2 = _init_conv_bn(keys[5], 512, 512)
        self.cg3 = _init_conv_bn(keys[6], 1024, 1024)
        self.cg4 = _init_conv_bn(keys[7], 2048, 2048)
        # classifiers: Conv2d(C, n_classes, 1, bias=False)
        self.classifier1 = 0.05 * jax.random.normal(keys[8], (n_classes, 256, 1, 1), jnp.float32)
        self.classifier2 = 0.05 * jax.random.normal(keys[9], (n_classes, 512, 1, 1), jnp.float32)
        self.classifier3 = 0.05 * jax.random.normal(keys[10], (n_classes, 1024, 1, 1), jnp.float32)
        self.classifier4 = 0.05 * jax.random.normal(keys[11], (n_classes, 2048, 1, 1), jnp.float32)

    def __call__(self, x_nchw, separate=False):
        # single NCHW -> channel-last conversion (bf16) at the model boundary
        x = jnp.transpose(x_nchw, (0, 2, 3, 1)).astype(jnp.bfloat16)
        # backbone (stubs, see TODO above)
        x1 = conv1x1_bn_relu(x, **self.stage1, stride=4)
        x2 = conv1x1_bn_relu(x1, **self.stage2, stride=2)
        x3 = conv1x1_bn_relu(x2, **self.stage3, stride=1)
        x4 = conv1x1_bn_relu(x3, **self.stage4, stride=1)
        if separate:
            return (separate_head(x1, self.cg1, self.classifier1),
                    separate_head(x2, self.cg2, self.classifier2),
                    separate_head(x3, self.cg3, self.classifier3),
                    separate_head(x4, self.cg4, self.classifier4))
        # CG + classifier conv + relu (one fused kernel), then x[0] + x[1].flip(W)
        return (cam_head(x1, self.cg1, self.classifier1),
                cam_head(x2, self.cg2, self.classifier2),
                cam_head(x3, self.cg3, self.classifier3),
                cam_head(x4, self.cg4, self.classifier4))


# ----------------------------------------------------------------------------
# Pure-JAX reference (same bf16 handling) for correctness checking
# ----------------------------------------------------------------------------
def _reference_forward(model, x_nchw, separate=False, eps=1e-5):
    def conv_bn_relu(x, p, stride=1):
        xs = x[:, ::stride, ::stride, :]
        cout, cin = p["weight"].shape[0], p["weight"].shape[1]
        scale = p["gamma"] / jnp.sqrt(p["var"] + eps)
        w = (p["weight"].reshape(cout, cin) * scale[:, None]).T.astype(jnp.bfloat16)
        b = ((p["bias"] - p["mean"]) * scale + p["beta"]).astype(jnp.float32)
        y = jnp.dot(xs.astype(jnp.bfloat16), w, preferred_element_type=jnp.float32) + b
        return jnp.maximum(y, 0.0).astype(jnp.bfloat16)

    def head(feat, cg_p, cls_w):
        h = conv_bn_relu(feat, cg_p, 1)                         # (B,H,W,C) bf16
        nc = cls_w.shape[0]
        w = cls_w.reshape(nc, h.shape[-1]).astype(jnp.bfloat16)
        s = jnp.dot(h, w.T, preferred_element_type=jnp.float32)  # (B,H,W,nc)
        if separate:
            return jnp.transpose(s, (0, 3, 1, 2))                # (B,nc,H,W)
        s = jnp.maximum(s, 0.0)
        out = s[0] + jnp.flip(s[1], axis=1)                      # (H,W,nc)
        return jnp.transpose(out, (2, 0, 1))                     # (nc,H,W)

    x = jnp.transpose(x_nchw, (0, 2, 3, 1)).astype(jnp.bfloat16)
    x1 = conv_bn_relu(x, model.stage1, 4)
    x2 = conv_bn_relu(x1, model.stage2, 2)
    x3 = conv_bn_relu(x2, model.stage3, 1)
    x4 = conv_bn_relu(x3, model.stage4, 1)
    return (head(x1, model.cg1, model.classifier1),
            head(x2, model.cg2, model.classifier2),
            head(x3, model.cg3, model.classifier3),
            head(x4, model.cg4, model.classifier4))


if __name__ == "__main__":
    key = jax.random.PRNGKey(0)
    k_param, k_x = jax.random.split(key)
    model = CAMPallas(k_param, n_classes=2)

    # batch of 2 = (image, horizontally flipped image), RGB, 16x16
    x = jax.random.normal(k_x, (2, 3, 16, 16), jnp.float32)

    # fused CAM path
    outs = jax.block_until_ready(model(x))
    expected = [(2, 4, 4), (2, 2, 2), (2, 2, 2), (2, 2, 2)]
    for o, es in zip(outs, expected):
        assert o.shape == es, (o.shape, es)
        assert bool(jnp.all(jnp.isfinite(o)))
        assert bool(jnp.all(o >= 0.0))  # sum of two relu'd maps is non-negative

    # numerical check vs pure-JAX reference (same bf16 rounding)
    refs = _reference_forward(model, x)
    for o, r in zip(outs, refs):
        assert jnp.allclose(o, r, rtol=2e-2, atol=3e-2), \
            float(jnp.max(jnp.abs(o - jnp.asarray(r))))

    # separate=True path (raw classifier maps, no ReLU)
    seps = jax.block_until_ready(model(x, separate=True))
    exp_sep = [(2, 2, 4, 4), (2, 2, 2, 2), (2, 2, 2, 2), (2, 2, 2, 2)]
    refs_sep = _reference_forward(model, x, separate=True)
    for o, es, r in zip(seps, exp_sep, refs_sep):
        assert o.shape == es, (o.shape, es)
        assert bool(jnp.all(jnp.isfinite(o)))
        assert jnp.allclose(o, r, rtol=2e-2, atol=3e-2), \
            float(jnp.max(jnp.abs(o - jnp.asarray(r))))

    print("KERNEL_OK")
</pallas_src>

<mosaic_0001>
module attributes {stable_mosaic.version = 11 : i64} {
  func.func @_conv1x1_bn_relu_kernel(%arg0: i32, %arg1: i32, %arg2: memref<32x3xbf16, #tpu.memory_space<vmem>>, %arg3: memref<3x256xbf16, #tpu.memory_space<vmem>>, %arg4: memref<1x256xf32, #tpu.memory_space<vmem>>, %arg5: memref<32x256xbf16, #tpu.memory_space<vmem>>) attributes {dimension_semantics = [#tpu.dimension_semantics<parallel>, #tpu.dimension_semantics<parallel>], iteration_bounds = array<i64: 1, 1>, scalar_prefetch = 0 : i64, scratch_operands = 0 : i64, tpu.core_type = #tpu.core_type<tc>, window_params = [{transform_indices = @transform_0, window_bounds = array<i64: 32, 3>}, {transform_indices = @transform_1, window_bounds = array<i64: 3, 256>}, {transform_indices = @transform_2, window_bounds = array<i64: 1, 256>}, {transform_indices = @transform_3, window_bounds = array<i64: 32, 256>}]} {
    %c0 = arith.constant 0 : index
    %c0_0 = arith.constant 0 : index
    %0 = vector.load %arg2[%c0, %c0_0] : memref<32x3xbf16, #tpu.memory_space<vmem>>, vector<32x3xbf16>
    %c0_1 = arith.constant 0 : index
    %c0_2 = arith.constant 0 : index
    %1 = vector.load %arg3[%c0_1, %c0_2] : memref<3x256xbf16, #tpu.memory_space<vmem>>, vector<3x256xbf16>
    %cst = arith.constant dense<0.000000e+00> : vector<32x256xf32>
    %2 = tpu.matmul %0, %1, %cst {dimension_numbers = #tpu.dot_dimension_numbers<[1], [0], [0], [1], [0, 0, 1, 1], [], []>} : vector<32x3xbf16>, vector<3x256xbf16>, vector<32x256xf32> -> vector<32x256xf32>
    %c0_3 = arith.constant 0 : index
    %c0_4 = arith.constant 0 : index
    %3 = vector.load %arg4[%c0_3, %c0_4] : memref<1x256xf32, #tpu.memory_space<vmem>>, vector<1x256xf32>
    %4 = vector.broadcast %3 : vector<1x256xf32> to vector<32x256xf32>
    %5 = arith.addf %2, %4 : vector<32x256xf32>
    %cst_5 = arith.constant 0.000000e+00 : f32
    %6 = vector.broadcast %cst_5 : f32 to vector<32x256xf32>
    %7 = arith.maximumf %5, %6 : vector<32x256xf32>
    %8 = arith.truncf %7 : vector<32x256xf32> to vector<32x256xbf16>
    %c0_6 = arith.constant 0 : index
    %c0_7 = arith.constant 0 : index
    %9 = vector.load %arg5[%c0_6, %c0_7] : memref<32x256xbf16, #tpu.memory_space<vmem>>, vector<32x256xbf16>
    tpu.vector_store %arg5[%c0_6, %c0_7], %8 {strides = array<i32>} : memref<32x256xbf16, #tpu.memory_space<vmem>>, vector<32x256xbf16>,
    return
  }
  func.func @transform_0(%arg0: i32, %arg1: i32) -> (i32, i32) {
    %c0_i32 = arith.constant 0 : i32
    %c0_i32_0 = arith.constant 0 : i32
    return %arg0, %c0_i32 : i32, i32
  }
  func.func @transform_1(%arg0: i32, %arg1: i32) -> (i32, i32) {
    %c0_i32 = arith.constant 0 : i32
    %c0_i32_0 = arith.constant 0 : i32
    return %c0_i32, %arg1 : i32, i32
  }
  func.func @transform_2(%arg0: i32, %arg1: i32) -> (i32, i32) {
    %c0_i32 = arith.constant 0 : i32
    %c0_i32_0 = arith.constant 0 : i32
    return %c0_i32, %arg1 : i32, i32
  }
  func.func @transform_3(%arg0: i32, %arg1: i32) -> (i32, i32) {
    %c0_i32 = arith.constant 0 : i32
    return %arg0, %arg1 : i32, i32
  }
}

</mosaic_0001>

<bundles_post_ra>
// kernel: tpu_custom_call.1
= control target key start
LH: loop header
LB: loop body
LE: loop exit
PB: predicated region body
PF: predicated region fallthrough
CT: control target
= control target key end

     0   :  { %vm59_vm0 = vcmask 1040384   ;;  %vm60_vm1 = vcmask 1041408   ;;  %v218_v2 = vmov 65535   ;;  %v219_v4 = vmov 0   ;;  %s258_s0 = inlined_call_operand.vmem [shape: bf16[32,3], index: 0, kind: input, shape index: {}]   ;;  %s259_s1 = inlined_call_operand.vmem [shape: bf16[3,256], index: 1, kind: input, shape index: {}]   ;;  %s260_s2 = inlined_call_operand.vmem [shape: f32[1,256], index: 2, kind: input, shape index: {}]   ;;  %s261_s3 = inlined_call_operand.hbm [shape: bf16[32,256], index: 3, kind: output, shape index: {}]  }
   0x1   :  { %v176_v0 = vld.sshfl [vmem:[%s259_s1] sm:$0x33 pattern:$0x76325410]  ;;  %v61_v3 = vsel %vm59_vm0, 4294967295, %v218_v2  ;;  %101 = vmatprep.mubr.bf16.mxu0 %v219_v4  ;;  %111 = vmatprep.mubr.bf16.mxu1 %v219_v4 }
   0x2   :  { %v51_v1 = vcombine.high %v176_v0, %v176_v0  ;;  %v62_v5 = vsel %vm60_vm1, %v61_v3, 0 }
   0x3   :  { %v64_v7 = vand.u32 %v176_v0, %v62_v5 }
   0x4   :  { %v67_v6 = vand.u32 %v62_v5, %v51_v1 }
   0x5   :  { %8 = vsyncpa [#allocation3], 0  ;;  %v194_v8 = vld [vmem:[%s258_s0] sm:$0xff]   ;;  %v195_v9 = vld [vmem:[%s258_s0 + $0x8] sm:$0xff]   ;;  %vm52_vm2 = vcmask 23552   ;;  %v23_v10 = vlaneseq  ;;  %s220_s0 = smov [#allocation2]  }
   0x6   :  { %83 = vmatprep.subr.bf16.mxu0 %v67_v6  ;;  %187 = vmatprep.subr.bf16.mxu1 %v67_v6  ;;  %v21_v13 = vld [vmem:[%s260_s2] sm:$0x3]  ;;  %s163_s2 = sshll.u32 %s220_s0, 4  ;;  %s164_s2 = int_to_ptr.vmem [resolvable:$true] %s163_s2 }
   0x7   :  { %84 = vmatpush1.bf16.msra.mxu0 %v64_v7  ;;  %188 = vmatpush1.bf16.msra.mxu1 %v64_v7  ;;  %v24_v11 = vshrl.u32 %v23_v10, 7  ;;  %s196_s19 = scalar_lea.vmem %s164_s2, 512  ;;  %p201_p1 = scmp.lt.s32.totalorder %s164_s2, %s164_s2 }
   0x8   :  { %p197_p0 = scmp.ne.s32.totalorder %s164_s2, %s196_s19  ;;  %p202_p2 = scmp.lt.s32.totalorder %s196_s19, %s196_s19 }
   0x9   :  { %v25_v12 = vsub.s32 0, %v24_v11  ;;  %v29_v14 = vsub.s32 1, %v24_v11 }
   0xa   :  { %177 = vmatmul.mubr.msk.bf16.vlgmr.msra.gmra.mxu0 %vm52_vm2, %v194_v8  ;;  %178 = vmatmul.mubr.msk.bf16.vlgmr.msra.gmra.mxu1 %vm52_vm2, %v195_v9  ;;  %p203_p3 = por %p202_p2, %p201_p1 }
   0xb   :  { %v26_v15 = vrot.slane %v21_v13, %v25_v12  ;;  %v30_v16 = vrot.slane %v21_v13, %v29_v14 }
   0xc   :  { %p204_p4 = pnand %p203_p3, %p197_p0 }
  0xca   :  { %v103_v17 = vpop.f32.mrf.mxu0  ;;  %v113_v18 = vpop.f32.mrf.mxu1 }
  0xcb   :  { %v104_v19 = vadd.f32 %v103_v17, %v26_v15  ;;  %v114_v20 = vadd.f32 %v113_v18, %v26_v15 }
  0xcc   :  { %v105_v21 = vpop.f32.mrf.mxu0  ;;  %v115_v22 = vpop.f32.mrf.mxu1 }
  0xcd   :  { %v106_v23 = vadd.f32 %v105_v21, %v30_v16  ;;  %v116_v24 = vadd.f32 %v115_v22, %v30_v16  ;;  %v122_v27 = vmax.f32 %v104_v19, 0.0  ;;  %v126_v28 = vmax.f32 %v114_v20, 0.0 }
  0xce   :  { %v107_v25 = vpop.f32.mrf.mxu0  ;;  %v117_v26 = vpop.f32.mrf.mxu1 }
  0xcf   :  { %v123_v29 = vmax.f32 %v106_v23, 0.0  ;;  %v127_v30 = vmax.f32 %v116_v24, 0.0  ;;  %v108_v31 = vadd.f32 %v107_v25, %v26_v15  ;;  %v118_v32 = vadd.f32 %v117_v26, %v26_v15 }
  0xd0   :  { %v109_v33 = vpop.f32.mrf.mxu0  ;;  %v119_v34 = vpop.f32.mrf.mxu1 }
  0xd1   :  { %v183_v35 = vpack.c.bf16 %v123_v29, %v122_v27  ;;  %v185_v36 = vpack.c.bf16 %v127_v30, %v126_v28  ;;  %v110_v37 = vadd.f32 %v109_v33, %v30_v16  ;;  %v120_v38 = vadd.f32 %v119_v34, %v30_v16 }
  0xd2   :  { %v124_v39 = vmax.f32 %v108_v31, 0.0  ;;  %v128_v40 = vmax.f32 %v118_v32, 0.0 }
  0xd3   :  { %154 = vst [vmem:[#allocation2] sm:$0xff] %v183_v35  ;;  %156 = vst [vmem:[#allocation2 + $0x10] sm:$0xff] %v185_v36  ;;  %v125_v41 = vmax.f32 %v110_v37, 0.0  ;;  %v129_v42 = vmax.f32 %v120_v38, 0.0 }
  0xd5   :  { %v184_v43 = vpack.c.bf16 %v125_v41, %v124_v39  ;;  %v186_v44 = vpack.c.bf16 %v129_v42, %v128_v40 }
  0xd7   :  { %155 = vst [vmem:[#allocation2 + $0x8] sm:$0xff] %v184_v43  ;;  %157 = vst [vmem:[#allocation2 + $0x18] sm:$0xff] %v186_v44 }
  0xd8   :  { %207 = shalt.err (!%p204_p4)
}
  0xd9   :  { %s221_s20 = smov 128   ;;  %s222_s21 = smov 8  }
  0xda   :  { %169 = dma.vmem_to_hbm [thread:$0]  %s164_s2, 512, %s261_s3, [#allocation3], %s221_s20, %s221_s20, %s222_s21  }
  0xdb   :  { %216 = dma.done.wait [#allocation3], 512  }
  0xdc   :  { %217 = vsyncadd [#allocation3], 4294966784 }
  0xdd   :  { %173 = vsyncpa [#allocation3], 1 }

</bundles_post_ra>
